<compile_context>
chip_gen: v7x
topology: tpu7x:2x2x1
jax: 0.10.0
libtpu: 0.0.40
codegen_flags: <defaults>
</compile_context>

<pallas_src>
import functools

import jax
import jax.numpy as jnp
from jax import lax
from jax.experimental import pallas as pl
from jax.experimental.pallas import tpu as pltpu
import numpy as np

_LANE = 128


def _round_up(x, m):
    return ((x + m - 1) // m) * m


def _vmem_budgets(bc):
    """Generation-aware VMEM sizing -> (vmem_limit_bytes, input_tile_budget)."""
    phys = 64 * 1024 * 1024  # conservative default == v7x per-TC VMEM
    try:
        info = pltpu.get_tpu_info()
        phys = int(getattr(info, "vmem_capacity_bytes", phys)) or phys
    except Exception:
        pass
    # v5e/v6e (128 MiB physical) -> 96 MiB scoped limit; v7x (64 MiB) -> 48 MiB.
    limit = int(min(phys * 3 // 4, 96 * 1024 * 1024))
    # Reserve room for the (bc, bc) f32 accumulator, the materialized matmul
    # result and headroom before sizing the streamed input tiles.
    acc_reserve = 3 * bc * bc * 4
    input_budget = max(0, limit - acc_reserve) // 2
    return limit, input_budget


def _plan_k_tiling(hw, bc, itemsize, splits, input_budget):
    """Pick K tile (tk), zero-padded hw, and K blocks per core split.

    The budget covers 2 inputs x 2 pipeline buffers plus the in-kernel D/S
    temporaries, all of width tk."""
    per_col = (4 + 2) * bc * itemsize  # 2 inputs x 2 buffers + D + S
    max_tk = max(_LANE, (input_budget // max(per_col, 1)) // _LANE * _LANE)
    hw_pad = _round_up(hw, _LANE)
    tk = min(max_tk, hw_pad)
    nk_total = _round_up(pl.cdiv(hw_pad, tk), splits)
    hw_pad = nk_total * tk
    return tk, hw_pad, nk_total // splits


def _tile_update(fx_ref, ft_ref):
    """One MXU matmul per K tile: D @ S^T contracting the h*w axis of both
    operands directly (no materialized transpose), f32 accumulation."""
    fx = fx_ref[...]
    ft = ft_ref[...]
    d = fx - ft
    s = fx + ft
    return lax.dot_general(
        d, s,
        dimension_numbers=(((1,), (1,)), ((), ())),
        preferred_element_type=jnp.float32,
    )


def _style_loss_kernel(fx_ref, ft_ref, loss_ref, acc_ref, *, inv_hw, inv_c2):
    """Single-core path: K reduction with in-kernel finalize to an SMEM scalar."""
    k = pl.program_id(0)

    @pl.when(k == 0)
    def _init():
        acc_ref[...] = jnp.zeros_like(acc_ref)

    acc_ref[...] += _tile_update(fx_ref, ft_ref)

    @pl.when(k == pl.num_programs(0) - 1)
    def _finalize():
        m = acc_ref[...]
        # Gx - Gt = (0.5 / (h*w)) * (M + M^T).  Scale BEFORE squaring to avoid
        # the hw^2-amplified intermediate (f32 precision / overflow risk).
        gdiff = (0.5 * inv_hw) * (m + m.T)
        loss_ref[0, 0] = inv_c2 * jnp.mean(gdiff * gdiff)


def _style_loss_partial_kernel(fx_ref, ft_ref, m_ref):
    """Multi-core path: each core reduces its own K range into a private
    (bc, bc) partial M; finalize happens in a tiny plain-XLA epilogue."""
    k = pl.program_id(1)

    @pl.when(k == 0)
    def _init():
        m_ref[...] = jnp.zeros_like(m_ref)

    m_ref[0, :, :] += _tile_update(fx_ref, ft_ref)


def style_loss(x, target, *, stream_dtype=None, tk=None, num_core_splits=None,
               allow_small_fallback=True):
    """Equivalent of StyleLoss.forward: returns (x, loss)."""
    assert x.shape == target.shape, "target must match input shape"
    b, c, h, w = x.shape
    bc, hw = b * c, h * w
    inv_hw = 1.0 / float(hw)
    inv_c2 = 1.0 / float(c) ** 2

    # PyTorch's x.view(b*c, h*w) for both input and (detached) style target.
    fx = x.reshape(bc, hw)
    ft = target.reshape(bc, hw)
    if stream_dtype is not None:
        # HBM-bound kernel: streaming bf16 halves bytes; accumulator stays f32.
        fx = fx.astype(stream_dtype)
        ft = ft.astype(stream_dtype)
    itemsize = jnp.dtype(fx.dtype).itemsize

    # Tiny-input fast path: pallas_call / pipeline setup dwarfs the work.
    if allow_small_fallback and tk is None and 2 * bc * hw * itemsize <= (1 << 21):
        fx32 = fx.astype(jnp.float32)
        ft32 = ft.astype(jnp.float32)
        gdiff = (fx32 @ fx32.T - ft32 @ ft32.T) * inv_hw
        return x, inv_c2 * jnp.mean(gdiff * gdiff)

    if num_core_splits is None:
        num_core_splits = 1  # TODO(synk): auto-detect 2 TensorCores on v7x.
    splits = max(1, int(num_core_splits))

    vmem_limit, input_budget = _vmem_budgets(bc)
    if tk is None:
        tk, hw_pad, nk_per_split = _plan_k_tiling(hw, bc, itemsize, splits,
                                                  input_budget)
    else:
        assert tk % _LANE == 0, "explicit tk must be a multiple of 128"
        hw_pad = _round_up(hw, tk)
        nk_total = _round_up(hw_pad // tk, splits)
        hw_pad = nk_total * tk
        nk_per_split = nk_total // splits

    if hw_pad != hw:
        # Zero columns contribute exactly 0 to D @ S^T -> result unchanged.
        pad = ((0, 0), (0, hw_pad - hw))
        fx = jnp.pad(fx, pad)
        ft = jnp.pad(ft, pad)

    cost = pl.CostEstimate(
        flops=2 * bc * bc * hw_pad,                    # one (bc,hw)x(hw,bc) matmul
        transcendentals=0,
        bytes_accessed=2 * bc * hw_pad * itemsize + splits * bc * bc * 4,
    )
    cparams = pltpu.CompilerParams(
        dimension_semantics=(("parallel", "arbitrary") if splits > 1
                             else ("arbitrary",)),
        vmem_limit_bytes=vmem_limit,
    )

    if splits == 1:
        kernel = functools.partial(_style_loss_kernel,
                                   inv_hw=inv_hw, inv_c2=inv_c2)
        loss = pl.pallas_call(
            kernel,
            out_shape=jax.ShapeDtypeStruct((1, 1), jnp.float32),
            grid_spec=pltpu.PrefetchScalarGridSpec(
                num_scalar_prefetch=0,
                grid=(nk_per_split,),
                in_specs=[
                    pl.BlockSpec((bc, tk), lambda k: (0, k)),
                    pl.BlockSpec((bc, tk), lambda k: (0, k)),
                ],
                out_specs=pl.BlockSpec(
                    (1, 1), lambda k: (0, 0),
                    memory_space=pltpu.MemorySpace.SMEM),
                scratch_shapes=[pltpu.VMEM((bc, bc), jnp.float32)],
            ),
            compiler_params=cparams,
            cost_estimate=cost,
        )(fx, ft)
        return x, loss[0, 0]

    # Dual-TensorCore K split (v7x megacore): leading "parallel" axis, one
    # resident (bc, bc) partial accumulator per core, summed + finalized in a
    # tiny XLA epilogue.  Runs correctly (serially) on 1-TC chips as well.
    nk = nk_per_split
    partials = pl.pallas_call(
        _style_loss_partial_kernel,
        out_shape=jax.ShapeDtypeStruct((splits, bc, bc), jnp.float32),
        grid_spec=pltpu.PrefetchScalarGridSpec(
            num_scalar_prefetch=0,
            grid=(splits, nk),
            in_specs=[
                pl.BlockSpec((bc, tk), lambda p, k: (0, p * nk + k)),
                pl.BlockSpec((bc, tk), lambda p, k: (0, p * nk + k)),
            ],
            out_specs=pl.BlockSpec((1, bc, bc), lambda p, k: (p, 0, 0)),
        ),
        compiler_params=cparams,
        cost_estimate=cost,
    )(fx, ft)
    m = partials.sum(axis=0)
    gdiff = (0.5 * inv_hw) * (m + m.T)
    return x, inv_c2 * jnp.mean(gdiff * gdiff)


def _style_loss_ref(x, target):
    """Pure-JAX f32 reference for correctness checking."""
    b, c, h, w = x.shape
    fx = x.reshape(b * c, h * w).astype(jnp.float32)
    ft = target.reshape(b * c, h * w).astype(jnp.float32)
    gx = (fx @ fx.T) / (h * w)
    gt = (ft @ ft.T) / (h * w)
    return jnp.mean((gx - gt) ** 2) / (c ** 2)


if __name__ == "__main__":
    key = jax.random.PRNGKey(0)
    kx, kt = jax.random.split(key)

    # Small NCHW feature-map shapes.
    x = jax.random.normal(kx, (2, 4, 16, 16), dtype=jnp.float32)
    # "target" is a fixed (detached) style feature map, built deterministically.
    target = jax.random.normal(kt, (2, 4, 16, 16), dtype=jnp.float32)

    loss_ref = np.asarray(_style_loss_ref(x, target))

    # 1) Default dispatch (tiny input -> XLA fast path).
    out_fast, loss_fast = style_loss(x, target)
    # 2) Forced Pallas, single K block.
    out_1, loss_1 = style_loss(x, target, allow_small_fallback=False)
    # 3) Forced K tiling (grid of 2) to exercise the pipelined accumulation.
    out_2, loss_2 = style_loss(x, target, tk=128, allow_small_fallback=False)
    # 4) Dual-core K split path (parallel leading axis + XLA epilogue).
    out_3, loss_3 = style_loss(x, target, tk=128, num_core_splits=2,
                               allow_small_fallback=False)
    # 5) bf16 streaming path (HBM-bound win); looser tolerance vs f32 reference.
    out_4, loss_4 = style_loss(x, target, tk=128, stream_dtype=jnp.bfloat16,
                               allow_small_fallback=False)
    jax.block_until_ready((out_fast, loss_fast, loss_1, loss_2, loss_3, loss_4))

    for name, val in (("fast", loss_fast), ("block", loss_1),
                      ("tiled", loss_2), ("split", loss_3)):
        assert np.allclose(np.asarray(val), loss_ref, rtol=1e-4, atol=1e-6), \
            (name, np.asarray(val), loss_ref)
    assert np.allclose(np.asarray(loss_4), loss_ref, rtol=1e-1, atol=1e-4), \
        ("bf16", np.asarray(loss_4), loss_ref)
    assert np.array_equal(np.asarray(out_1), np.asarray(x))

    print("KERNEL_OK")
</pallas_src>

<mosaic_0001>
module attributes {stable_mosaic.version = 11 : i64} {
  func.func @_style_loss_kernel(%arg0: i32, %arg1: memref<8x256xf32, #tpu.memory_space<vmem>>, %arg2: memref<8x256xf32, #tpu.memory_space<vmem>>, %arg3: memref<1x1xf32, #tpu.memory_space<smem>>, %arg4: memref<8x8xf32, #tpu.memory_space<vmem>>) attributes {dimension_semantics = [#tpu.dimension_semantics<arbitrary>], iteration_bounds = array<i64: 1>, scalar_prefetch = 0 : i64, scratch_operands = 1 : i64, tpu.core_type = #tpu.core_type<tc>, window_params = [{transform_indices = @transform_0, window_bounds = array<i64: 8, 256>}, {transform_indices = @transform_1, window_bounds = array<i64: 8, 256>}, {transform_indices = @transform_2, window_bounds = array<i64: 1, 1>}]} {
    %c0_i32 = arith.constant 0 : i32
    %0 = arith.cmpi eq, %arg0, %c0_i32 : i32
    %1 = arith.extui %0 : i1 to i32
    %c0_i32_0 = arith.constant 0 : i32
    %2 = arith.cmpi ne, %1, %c0_i32_0 : i32
    scf.if %2 {
      %cst_10 = arith.constant 0.000000e+00 : f32
      %14 = vector.broadcast %cst_10 : f32 to vector<8x8xf32>
      %c0_11 = arith.constant 0 : index
      %c0_12 = arith.constant 0 : index
      %15 = vector.load %arg4[%c0_11, %c0_12] : memref<8x8xf32, #tpu.memory_space<vmem>>, vector<8x8xf32>
      tpu.vector_store %arg4[%c0_11, %c0_12], %14 {strides = array<i32>} : memref<8x8xf32, #tpu.memory_space<vmem>>, vector<8x8xf32>,
    } else {
    }
    %c0 = arith.constant 0 : index
    %c0_1 = arith.constant 0 : index
    %3 = vector.load %arg4[%c0, %c0_1] : memref<8x8xf32, #tpu.memory_space<vmem>>, vector<8x8xf32>
    %c0_2 = arith.constant 0 : index
    %c0_3 = arith.constant 0 : index
    %4 = vector.load %arg1[%c0_2, %c0_3] : memref<8x256xf32, #tpu.memory_space<vmem>>, vector<8x256xf32>
    %c0_4 = arith.constant 0 : index
    %c0_5 = arith.constant 0 : index
    %5 = vector.load %arg2[%c0_4, %c0_5] : memref<8x256xf32, #tpu.memory_space<vmem>>, vector<8x256xf32>
    %6 = arith.subf %4, %5 : vector<8x256xf32>
    %7 = arith.addf %4, %5 : vector<8x256xf32>
    %cst = arith.constant dense<0.000000e+00> : vector<8x8xf32>
    %8 = tpu.matmul %6, %7, %cst {dimension_numbers = #tpu.dot_dimension_numbers<[1], [1], [0], [0], [0, 0, 1, 0], [], []>} : vector<8x256xf32>, vector<8x256xf32>, vector<8x8xf32> -> vector<8x8xf32>
    %9 = arith.addf %3, %8 : vector<8x8xf32>
    %c0_6 = arith.constant 0 : index
    %c0_7 = arith.constant 0 : index
    %10 = vector.load %arg4[%c0_6, %c0_7] : memref<8x8xf32, #tpu.memory_space<vmem>>, vector<8x8xf32>
    tpu.vector_store %arg4[%c0_6, %c0_7], %9 {strides = array<i32>} : memref<8x8xf32, #tpu.memory_space<vmem>>, vector<8x8xf32>,
    %c0_i32_8 = arith.constant 0 : i32
    %11 = arith.cmpi eq, %arg0, %c0_i32_8 : i32
    %12 = arith.extui %11 : i1 to i32
    %c0_i32_9 = arith.constant 0 : i32
    %13 = arith.cmpi ne, %12, %c0_i32_9 : i32
    scf.if %13 {
      %c0_10 = arith.constant 0 : index
      %c0_11 = arith.constant 0 : index
      %14 = vector.load %arg4[%c0_10, %c0_11] : memref<8x8xf32, #tpu.memory_space<vmem>>, vector<8x8xf32>
      %15 = tpu.transpose %14, [1, 0] : vector<8x8xf32> -> vector<8x8xf32>
      %16 = arith.addf %14, %15 : vector<8x8xf32>
      %cst_12 = arith.constant 0.001953125 : f32
      %17 = vector.broadcast %cst_12 : f32 to vector<8x8xf32>
      %18 = arith.mulf %17, %16 : vector<8x8xf32>
      %19 = arith.mulf %18, %18 : vector<8x8xf32>
      %20 = vector.shape_cast %19 : vector<8x8xf32> to vector<1x8x8xf32>
      %cst_13 = arith.constant dense<0.000000e+00> : vector<1xf32>
      %21 = vector.multi_reduction <add>, %20, %cst_13 [1, 2] : vector<1x8x8xf32> to vector<1xf32>
      %22 = vector.shape_cast %21 : vector<1xf32> to vector<1x1x1xf32>
      %23 = vector.extract %22[0, 0, 0] : f32 from vector<1x1x1xf32>
      %cst_14 = arith.constant 6.400000e+01 : f32
      %24 = arith.divf %23, %cst_14 : f32
      %cst_15 = arith.constant 6.250000e-02 : f32
      %25 = arith.mulf %cst_15, %24 : f32
      %c0_16 = arith.constant 0 : index
      %c0_17 = arith.constant 0 : index
      %26 = memref.load %arg3[%c0_16, %c0_17] : memref<1x1xf32, #tpu.memory_space<smem>>
      memref.store %25, %arg3[%c0_16, %c0_17] : memref<1x1xf32, #tpu.memory_space<smem>>
    } else {
    }
    return
  }
  func.func @transform_0(%arg0: i32) -> (i32, i32) {
    %c0_i32 = arith.constant 0 : i32
    %c0_i32_0 = arith.constant 0 : i32
    return %c0_i32, %arg0 : i32, i32
  }
  func.func @transform_1(%arg0: i32) -> (i32, i32) {
    %c0_i32 = arith.constant 0 : i32
    %c0_i32_0 = arith.constant 0 : i32
    return %c0_i32, %arg0 : i32, i32
  }
  func.func @transform_2(%arg0: i32) -> (i32, i32) {
    %c0_i32 = arith.constant 0 : i32
    %c0_i32_0 = arith.constant 0 : i32
    %c0_i32_1 = arith.constant 0 : i32
    return %c0_i32, %c0_i32_0 : i32, i32
  }
}

</mosaic_0001>

<bundles_post_ra>
// kernel: tpu_custom_call.1
= control target key start
LH: loop header
LB: loop body
LE: loop exit
PB: predicated region body
PF: predicated region fallthrough
CT: control target
= control target key end

     0   :  { %7 = vsyncpa [#allocation4], 0  ;;  %s318_s0 = inlined_call_operand.hbm [shape: f32[8,256], index: 0, kind: input, shape index: {}]   ;;  %s319_s1 = inlined_call_operand.hbm [shape: f32[8,256], index: 1, kind: input, shape index: {}]   ;;  %s320_s2 = inlined_call_operand.hbm [shape: f32[1,1], index: 2, kind: output, shape index: {}]  }
   0x1   :  { %8 = vsyncpa [#allocation7], 0 }
   0x2   :  { %9 = vsyncpa [#allocation5], 0  ;;  %s260_s9 = smov [#allocation3]   ;;  %s261_s11 = smov [#allocation6]  }
   0x3   :  { %s16_s10 = sshll.u32 %s260_s9, 4  ;;  %s26_s12 = sshll.u32 %s261_s11, 4  ;;  %s17_s10 = int_to_ptr.vmem [resolvable:$true] %s16_s10  ;;  %s27_s12 = int_to_ptr.vmem [resolvable:$true] %s26_s12 }
   0x4   :  { %s200_s15 = scalar_lea.hbm %s318_s0, 256 }
   0x5   :  { %p201_p0 = scmp.ne.s32.totalorder %s318_s0, %s200_s15  ;;  %p204_p1 = scmp.lt.u32.totalorder %s200_s15, %s318_s0 }
   0x7   :  { %p206_p2 = pnand %p204_p1, %p201_p0 }
   0x9   :  { %209 = shalt.err (!%p206_p2)
}
   0xa   :  { %s210_s20 = scalar_lea.vmem %s17_s10, 256  ;;  %p215_p4 = scmp.lt.s32.totalorder %s17_s10, %s17_s10 }
   0xb   :  { %p211_p3 = scmp.ne.s32.totalorder %s17_s10, %s210_s20  ;;  %p216_p5 = scmp.lt.s32.totalorder %s210_s20, %s210_s20 }
   0xd   :  { %p217_p6 = por %p216_p5, %p215_p4 }
   0xf   :  { %p218_p7 = pnand %p217_p6, %p211_p3 }
  0x11   :  { %221 = shalt.err (!%p218_p7)
}
  0x12   :  { %19 = dma.hbm_to_vmem [thread:$0]  %s318_s0, 256, %s17_s10, [#allocation4]  }
  0x13   :  { %s222_s25 = scalar_lea.hbm %s319_s1, 256 }
  0x14   :  { %p223_p8 = scmp.ne.s32.totalorder %s319_s1, %s222_s25  ;;  %p226_p9 = scmp.lt.u32.totalorder %s222_s25, %s319_s1 }
  0x16   :  { %p228_p10 = pnand %p226_p9, %p223_p8 }
  0x18   :  { %231 = shalt.err (!%p228_p10)
}
  0x19   :  { %s232_s30 = scalar_lea.vmem %s27_s12, 256  ;;  %p237_p12 = scmp.lt.s32.totalorder %s27_s12, %s27_s12 }
  0x1a   :  { %p233_p11 = scmp.ne.s32.totalorder %s27_s12, %s232_s30  ;;  %p238_p13 = scmp.lt.s32.totalorder %s232_s30, %s232_s30 }
  0x1c   :  { %p239_p0 = por %p238_p13, %p237_p12 }
  0x1e   :  { %p240_p1 = pnand %p239_p0, %p233_p11 }
  0x20   :  { %243 = shalt.err (!%p240_p1)
}
  0x21   :  { %29 = dma.hbm_to_vmem [thread:$0]  %s319_s1, 256, %s27_s12, [#allocation7]  }
  0x22   :  { %254 = dma.done.wait [#allocation4], 256  }
  0x23   :  { %255 = vsyncadd [#allocation4], 4294967040 }
  0x24   :  { %256 = dma.done.wait [#allocation7], 256  }
  0x25   :  { %257 = vsyncadd [#allocation7], 4294967040  ;;  %vm40_vm0 = vcmask 64512   ;;  %v262_v0 = vmov 0.0   ;;  %v44_v1 = vld [vmem:[#allocation3 + $0x8] sm:$0xff]  ;;  %v46_v2 = vld [vmem:[#allocation6 + $0x8] sm:$0xff] }
  0x26   :  { %41 = vst.msk [vmem:[#allocation2] sm:$0xff] %vm40_vm0, %v262_v0  ;;  %v43_v3 = vld [vmem:[#allocation3] sm:$0xff]  ;;  %v50_v4 = vadd.f32 %v46_v2, %v44_v1  ;;  %v45_v5 = vld [vmem:[#allocation6] sm:$0xff]  ;;  %v48_v6 = vsub.f32 %v44_v1, %v46_v2  ;;  %s244_s8 = scalar_lea.hbm %s320_s2, 16 }
  0x27   :  { %v49_v7 = vadd.f32 %v45_v5, %v43_v3  ;;  %v47_v8 = vsub.f32 %v43_v3, %v45_v5  ;;  %p245_p2 = scmp.ne.s32.totalorder %s320_s2, %s244_s8  ;;  %p248_p3 = scmp.lt.u32.totalorder %s244_s8, %s320_s2 }
  0x28   :  { %51 = vmatprep.subr.mxu0 %v50_v4  ;;  %115 = vmatprep.mubr.f32.mxu0 %v48_v6 }
  0x29   :  { %52 = vmatpush1.xpose.msra.mxu0 %v49_v7  ;;  %p250_p4 = pnand %p248_p3, %p245_p2 }
  0x2c   :  { %116 = vmatmul.mubr.f32.vlgmr.msra.gmra.mrb[0].mxu0 %v47_v8 }
  0x2d   :  { %v42_v9 = vld [vmem:[#allocation2] sm:$0xff] }
  0xff   :  { %v117_v10 = vpop.f32.mrb[0].mxu0 }
 0x100   :  { %v121_v11 = vadd.f32 %v117_v10, %v42_v9  ;;  %v119_v12 = vpop.f32.mrb[1].mxu0 }
 0x102   :  { %123 = vst.msk [vmem:[#allocation2] sm:$0xff] %vm40_vm0, %v121_v11 }
 0x109   :  { %v127_v13 = vld [vmem:[#allocation2] sm:$0xff] }
 0x10a   :  { %128 = vxpose.xlu0.b32.start.end [1/1] (short) (narrow) %v127_v13, 8 }
 0x18a   :  { %v144_v14 = vpop.trf.xlu0 }
 0x18b   :  { %v160_v15 = vadd.f32 %v144_v14, %v127_v13 }
 0x18d   :  { %v161_v16 = vmul.f32 0.001953125, %v160_v15 }
 0x18f   :  { %v162_v17 = vmul.f32 %v161_v16, %v161_v16 }
 0x191   :  { %v163_v18 = vsel %vm40_vm0, %v162_v17, 0.0 }
 0x192   :  { %164 = vadd.xlane.f32.xlu0 %v163_v18 }
 0x21f   :  { %v165_v19 = vpop.xlane.xlu0 %164 }
 0x220   :  { %v166_v20 = vrot.slane %v165_v19, 4 }
 0x222   :  { %v167_v21 = vadd.f32 %v166_v20, %v165_v19 }
 0x224   :  { %v168_v22 = vrot.slane %v167_v21, 2 }
 0x226   :  { %v169_v23 = vadd.f32 %v168_v22, %v167_v21 }
 0x228   :  { %v170_v24 = vrot.slane %v169_v23, 1 }
 0x22a   :  { %v171_v25 = vadd.f32 %v170_v24, %v169_v23 }
 0x22c   :  { %194 = vpush %v171_v25 }
 0x25d   :  { %s195_s1 = spop %194 }
 0x25e   :  { %s175_s4 = smul.f32 0.015625, %s195_s1 }
 0x260   :  { %s176_s5 = smul.f32 0.0625, %s175_s4 }
 0x262   :  { %178 = sst [smem:[#allocation8]] %s176_s5 }
 0x263   :  { %253 = shalt.err (!%p250_p4)
}
 0x264   :  { %s263_s13 = smov [#allocation8]  }
 0x265   :  { %186 = dma.smem_to_hbm %s263_s13, 16, %s320_s2, [#allocation5]  }
 0x266   :  { %258 = dma.done.wait [#allocation5], 16  }
 0x267   :  { %259 = vsyncadd [#allocation5], 4294967280 }
 0x268   :  { %190 = sfence }
 0x269   :  { %191 = vsyncpa [#allocation4], 1 }
 0x26a   :  { %192 = vsyncpa [#allocation7], 1 }
 0x26b   :  { %193 = vsyncpa [#allocation5], 1 }

</bundles_post_ra>
